<compile_context>
chip_gen: v7x
topology: tpu7x:2x2x1
jax: 0.10.0
libtpu: 0.0.40
codegen_flags: <defaults>
</compile_context>

<pallas_src>
import jax
import jax.numpy as jnp
from jax.experimental import pallas as pl
from jax.experimental.pallas import tpu as pltpu

# ---------------- model hyper-parameters (small, synthetic) ----------------
C_S = 32          # input seq embedding dim
HIDDEN = 32       # hidden_dim
NO_BLOCKS = 2     # no_blocks
NO_ANGLES = 4     # no_angles
ANGLE_BINS = 8    # angle_bins
OUT_DIM = NO_ANGLES * ANGLE_BINS   # 32

BATCH = 2
SEQ = 8

# ---------------- packed parameter slab layout (sublane axis) ---------------
# slab rows: [ w_in^T (HIDDEN) | w1^T (HIDDEN) | w2^T (HIDDEN) | w_out^T (OUT_DIM) ]
OFF_IN = 0
OFF_1 = HIDDEN
OFF_2 = 2 * HIDDEN
OFF_OUT = 3 * HIDDEN
W_ROWS = 3 * HIDDEN + OUT_DIM          # 128 (multiple of 8 -> cheap static views)
W_COLS = max(C_S, HIDDEN)              # 32


def torsion_head_kernel(x_ref, w_ref, b_ref, out_ref):
    """Transposed layout.

    x_ref  : (C_S,    T) bf16   -- T = tile_cols (>=128), rows of batch*seq on lanes
    w_ref  : (W_ROWS, W_COLS) bf16  packed [w_in^T; w1^T; w2^T; w_out^T]
    b_ref  : (W_ROWS, 1) f32        packed column biases
    out_ref: (OUT_DIM, T) f32
    """
    # --- slice the packed slabs ONCE (sublane-aligned static views) ---------
    w_in = w_ref[OFF_IN:OFF_IN + HIDDEN, 0:C_S]          # (HIDDEN, C_S) bf16
    w1 = w_ref[OFF_1:OFF_1 + HIDDEN, 0:HIDDEN]           # (HIDDEN, HIDDEN)
    w2 = w_ref[OFF_2:OFF_2 + HIDDEN, 0:HIDDEN]           # (HIDDEN, HIDDEN)
    w_out = w_ref[OFF_OUT:OFF_OUT + OUT_DIM, 0:HIDDEN]   # (OUT_DIM, HIDDEN)
    b_in = b_ref[OFF_IN:OFF_IN + HIDDEN, :]              # (HIDDEN, 1) f32
    b1 = b_ref[OFF_1:OFF_1 + HIDDEN, :]
    b2 = b_ref[OFF_2:OFF_2 + HIDDEN, :]
    b_out = b_ref[OFF_OUT:OFF_OUT + OUT_DIM, :]          # (OUT_DIM, 1)

    # --- linear_in(relu(x)) : s^T = W_in^T @ relu(x)^T + b ------------------
    x = jnp.maximum(x_ref[...], 0)                       # relu (exact in bf16)
    s = jnp.dot(w_in, x, preferred_element_type=jnp.float32) + b_in   # f32

    # --- residual Angle_Block, applied NO_BLOCKS times (static unroll) ------
    # activations stay f32 on the VPU; cast to bf16 only at the MXU operand.
    for _ in range(NO_BLOCKS):
        h = jnp.maximum(s, 0.0).astype(jnp.bfloat16)
        h = jnp.dot(w1, h, preferred_element_type=jnp.float32) + b1
        h = jnp.maximum(h, 0.0).astype(jnp.bfloat16)
        h = jnp.dot(w2, h, preferred_element_type=jnp.float32) + b2
        s = s + h

    # --- final relu + linear_out_dis ----------------------------------------
    s = jnp.maximum(s, 0.0).astype(jnp.bfloat16)
    logits = jnp.dot(w_out, s, preferred_element_type=jnp.float32) + b_out
    # logits: (OUT_DIM, T) f32, angle a / bin b at row a*ANGLE_BINS + b

    # --- per-angle log_softmax over ANGLE_BINS contiguous sublanes ----------
    # Each slice is an 8-sublane-aligned view; reductions are sublane (XLU)
    # reductions and every store is a full-lane, unmasked (8, T) store.
    for a in range(NO_ANGLES):
        lo = a * ANGLE_BINS
        blk = logits[lo:lo + ANGLE_BINS, :]
        m = jnp.max(blk, axis=0, keepdims=True)
        z = blk - m
        lse = jnp.log(jnp.sum(jnp.exp(z), axis=0, keepdims=True))
        out_ref[lo:lo + ANGLE_BINS, :] = z - lse


def _round_up(x, m):
    return (x + m - 1) // m * m


def _pack_params(params):
    """Pack the 8 parameter tensors into one bf16 weight slab + one f32 bias column."""
    w_slab = jnp.zeros((W_ROWS, W_COLS), jnp.float32)
    w_slab = w_slab.at[OFF_IN:OFF_IN + HIDDEN, 0:C_S].set(params["w_in"].T)
    w_slab = w_slab.at[OFF_1:OFF_1 + HIDDEN, 0:HIDDEN].set(params["w1"].T)
    w_slab = w_slab.at[OFF_2:OFF_2 + HIDDEN, 0:HIDDEN].set(params["w2"].T)
    w_slab = w_slab.at[OFF_OUT:OFF_OUT + OUT_DIM, 0:HIDDEN].set(params["w_out"].T)
    b_slab = jnp.concatenate(
        [params["b_in"].reshape(HIDDEN, 1),
         params["b1"].reshape(HIDDEN, 1),
         params["b2"].reshape(HIDDEN, 1),
         params["b_out"].reshape(OUT_DIM, 1)], axis=0)
    return w_slab.astype(jnp.bfloat16), b_slab.astype(jnp.float32)


@jax.jit
def torsion_head_forward(seq_embed, params):
    """seq_embed: [batch, seq, C_S] -> {'angles_dis': [batch, seq, NO_ANGLES, ANGLE_BINS]}."""
    b, s, _ = seq_embed.shape
    n = b * s

    # Lane-tile size: one big tile (up to 512 lanes) per grid step; pad the
    # flattened rows so no remainder is dropped.  For the toy n=16 this gives
    # tile_cols=128, n_pad=128, grid=(1,).
    tile_cols = min(512, _round_up(n, 128))
    n_pad = _round_up(n, tile_cols)
    grid = (n_pad // tile_cols,)   # on v7x prefer an even grid count for 2-TC balance

    x2d = seq_embed.reshape(n, C_S).astype(jnp.float32)
    if n_pad != n:
        x2d = jnp.pad(x2d, ((0, n_pad - n), (0, 0)))
    xT = x2d.T.astype(jnp.bfloat16)                       # (C_S, n_pad), bf16 stream

    w_slab, b_slab = _pack_params(params)

    flops = 2 * n_pad * (C_S * HIDDEN
                         + NO_BLOCKS * 2 * HIDDEN * HIDDEN
                         + HIDDEN * OUT_DIM)
    transcendentals = n_pad * NO_ANGLES * (ANGLE_BINS + 1)      # exp + log
    bytes_accessed = (xT.size * 2 + n_pad * OUT_DIM * 4
                      + w_slab.size * 2 + b_slab.size * 4)

    outT = pl.pallas_call(
        torsion_head_kernel,
        out_shape=jax.ShapeDtypeStruct((OUT_DIM, n_pad), jnp.float32),
        grid=grid,
        in_specs=[
            pl.BlockSpec((C_S, tile_cols), lambda i: (0, i)),     # x^T tile
            pl.BlockSpec((W_ROWS, W_COLS), lambda i: (0, 0)),     # packed weights
            pl.BlockSpec((W_ROWS, 1), lambda i: (0, 0)),          # packed biases
        ],
        out_specs=pl.BlockSpec((OUT_DIM, tile_cols), lambda i: (0, i)),
        compiler_params=pltpu.CompilerParams(
            dimension_semantics=("parallel",)),
        cost_estimate=pl.CostEstimate(
            flops=flops,
            transcendentals=transcendentals,
            bytes_accessed=bytes_accessed),
    )(xT, w_slab, b_slab)

    out = outT.T[:n]                                       # (n, OUT_DIM)
    angles_dis = out.reshape(b, s, NO_ANGLES, ANGLE_BINS)
    return {"angles_dis": angles_dis}


def make_params(key):
    """Deterministic synthetic parameters.

    Weights are stored as (in_dim, out_dim); this is the transposed layout of
    torch.nn.Linear.weight, so y = x @ W + b matches torch semantics."""
    ks = jax.random.split(key, 8)
    scale = 0.1
    return {
        "w_in": scale * jax.random.normal(ks[0], (C_S, HIDDEN), jnp.float32),
        "b_in": scale * jax.random.normal(ks[1], (1, HIDDEN), jnp.float32),
        "w1": scale * jax.random.normal(ks[2], (HIDDEN, HIDDEN), jnp.float32),
        "b1": scale * jax.random.normal(ks[3], (1, HIDDEN), jnp.float32),
        "w2": scale * jax.random.normal(ks[4], (HIDDEN, HIDDEN), jnp.float32),
        "b2": scale * jax.random.normal(ks[5], (1, HIDDEN), jnp.float32),
        "w_out": scale * jax.random.normal(ks[6], (HIDDEN, OUT_DIM), jnp.float32),
        "b_out": scale * jax.random.normal(ks[7], (1, OUT_DIM), jnp.float32),
    }


def reference_forward(seq_embed, params):
    """Pure-JAX f32 reference mirroring the PyTorch module exactly."""
    x = jnp.maximum(seq_embed, 0.0)
    s = x @ params["w_in"] + params["b_in"][0]
    for _ in range(NO_BLOCKS):
        h = jnp.maximum(s, 0.0) @ params["w1"] + params["b1"][0]
        h = jnp.maximum(h, 0.0) @ params["w2"] + params["b2"][0]
        s = s + h
    s = jnp.maximum(s, 0.0)
    logits = s @ params["w_out"] + params["b_out"][0]
    logits = logits.reshape(seq_embed.shape[:-1] + (NO_ANGLES, ANGLE_BINS))
    return jax.nn.log_softmax(logits, axis=-1)


if __name__ == "__main__":
    key = jax.random.PRNGKey(0)
    k_x, k_p = jax.random.split(key)
    seq_embed = jax.random.normal(k_x, (BATCH, SEQ, C_S), jnp.float32)
    params = make_params(k_p)

    out = torsion_head_forward(seq_embed, params)
    out = jax.block_until_ready(out)
    angles_dis = out["angles_dis"]

    ref = reference_forward(seq_embed, params)
    assert angles_dis.shape == (BATCH, SEQ, NO_ANGLES, ANGLE_BINS)
    # bf16 MXU operands (f32 accumulation) -> relaxed tolerance vs f32 reference.
    max_err = float(jnp.max(jnp.abs(angles_dis - ref)))
    assert jnp.allclose(angles_dis, ref, atol=5e-2, rtol=5e-2), max_err
    # log_softmax sanity: each angle distribution sums to 1.
    assert jnp.allclose(jnp.sum(jnp.exp(angles_dis), axis=-1), 1.0, atol=1e-3)

    print("KERNEL_OK")
</pallas_src>

<mosaic_0001>
module attributes {stable_mosaic.version = 11 : i64} {
  func.func @torsion_head_kernel(%arg0: i32, %arg1: memref<32x128xbf16, #tpu.memory_space<vmem>>, %arg2: memref<128x32xbf16, #tpu.memory_space<vmem>>, %arg3: memref<128x1xf32, #tpu.memory_space<vmem>>, %arg4: memref<32x128xf32, #tpu.memory_space<vmem>>) attributes {dimension_semantics = [#tpu.dimension_semantics<parallel>], iteration_bounds = array<i64: 1>, scalar_prefetch = 0 : i64, scratch_operands = 0 : i64, tpu.core_type = #tpu.core_type<tc>, window_params = [{transform_indices = @transform_0, window_bounds = array<i64: 32, 128>}, {pipeline_mode = #tpu.pipeline_mode<synchronous>, transform_indices = @transform_1, window_bounds = array<i64: 128, 32>}, {pipeline_mode = #tpu.pipeline_mode<synchronous>, transform_indices = @transform_2, window_bounds = array<i64: 128, 1>}, {transform_indices = @transform_3, window_bounds = array<i64: 32, 128>}]} {
    %c0 = arith.constant 0 : index
    %c0_0 = arith.constant 0 : index
    %0 = vector.load %arg2[%c0, %c0_0] : memref<128x32xbf16, #tpu.memory_space<vmem>>, vector<32x32xbf16>
    %c32 = arith.constant 32 : index
    %c0_1 = arith.constant 0 : index
    %1 = vector.load %arg2[%c32, %c0_1] : memref<128x32xbf16, #tpu.memory_space<vmem>>, vector<32x32xbf16>
    %c64 = arith.constant 64 : index
    %c0_2 = arith.constant 0 : index
    %2 = vector.load %arg2[%c64, %c0_2] : memref<128x32xbf16, #tpu.memory_space<vmem>>, vector<32x32xbf16>
    %c96 = arith.constant 96 : index
    %c0_3 = arith.constant 0 : index
    %3 = vector.load %arg2[%c96, %c0_3] : memref<128x32xbf16, #tpu.memory_space<vmem>>, vector<32x32xbf16>
    %c0_4 = arith.constant 0 : index
    %c0_5 = arith.constant 0 : index
    %4 = vector.load %arg3[%c0_4, %c0_5] : memref<128x1xf32, #tpu.memory_space<vmem>>, vector<32x1xf32>
    %c32_6 = arith.constant 32 : index
    %c0_7 = arith.constant 0 : index
    %5 = vector.load %arg3[%c32_6, %c0_7] : memref<128x1xf32, #tpu.memory_space<vmem>>, vector<32x1xf32>
    %c64_8 = arith.constant 64 : index
    %c0_9 = arith.constant 0 : index
    %6 = vector.load %arg3[%c64_8, %c0_9] : memref<128x1xf32, #tpu.memory_space<vmem>>, vector<32x1xf32>
    %c96_10 = arith.constant 96 : index
    %c0_11 = arith.constant 0 : index
    %7 = vector.load %arg3[%c96_10, %c0_11] : memref<128x1xf32, #tpu.memory_space<vmem>>, vector<32x1xf32>
    %c0_12 = arith.constant 0 : index
    %c0_13 = arith.constant 0 : index
    %8 = vector.load %arg1[%c0_12, %c0_13] : memref<32x128xbf16, #tpu.memory_space<vmem>>, vector<32x128xbf16>
    %cst = arith.constant 0.000000e+00 : bf16
    %9 = vector.broadcast %cst : bf16 to vector<32x128xbf16>
    %10 = arith.maximumf %8, %9 : vector<32x128xbf16>
    %cst_14 = arith.constant dense<0.000000e+00> : vector<32x128xf32>
    %11 = tpu.matmul %0, %10, %cst_14 {dimension_numbers = #tpu.dot_dimension_numbers<[1], [0], [0], [1], [0, 0, 1, 1], [], []>} : vector<32x32xbf16>, vector<32x128xbf16>, vector<32x128xf32> -> vector<32x128xf32>
    %12 = vector.broadcast %4 : vector<32x1xf32> to vector<32x128xf32>
    %13 = arith.addf %11, %12 : vector<32x128xf32>
    %cst_15 = arith.constant 0.000000e+00 : f32
    %14 = vector.broadcast %cst_15 : f32 to vector<32x128xf32>
    %15 = arith.maximumf %13, %14 : vector<32x128xf32>
    %16 = arith.truncf %15 : vector<32x128xf32> to vector<32x128xbf16>
    %cst_16 = arith.constant dense<0.000000e+00> : vector<32x128xf32>
    %17 = tpu.matmul %1, %16, %cst_16 {dimension_numbers = #tpu.dot_dimension_numbers<[1], [0], [0], [1], [0, 0, 1, 1], [], []>} : vector<32x32xbf16>, vector<32x128xbf16>, vector<32x128xf32> -> vector<32x128xf32>
    %18 = vector.broadcast %5 : vector<32x1xf32> to vector<32x128xf32>
    %19 = arith.addf %17, %18 : vector<32x128xf32>
    %cst_17 = arith.constant 0.000000e+00 : f32
    %20 = vector.broadcast %cst_17 : f32 to vector<32x128xf32>
    %21 = arith.maximumf %19, %20 : vector<32x128xf32>
    %22 = arith.truncf %21 : vector<32x128xf32> to vector<32x128xbf16>
    %cst_18 = arith.constant dense<0.000000e+00> : vector<32x128xf32>
    %23 = tpu.matmul %2, %22, %cst_18 {dimension_numbers = #tpu.dot_dimension_numbers<[1], [0], [0], [1], [0, 0, 1, 1], [], []>} : vector<32x32xbf16>, vector<32x128xbf16>, vector<32x128xf32> -> vector<32x128xf32>
    %24 = vector.broadcast %6 : vector<32x1xf32> to vector<32x128xf32>
    %25 = arith.addf %23, %24 : vector<32x128xf32>
    %26 = arith.addf %13, %25 : vector<32x128xf32>
    %cst_19 = arith.constant 0.000000e+00 : f32
    %27 = vector.broadcast %cst_19 : f32 to vector<32x128xf32>
    %28 = arith.maximumf %26, %27 : vector<32x128xf32>
    %29 = arith.truncf %28 : vector<32x128xf32> to vector<32x128xbf16>
    %cst_20 = arith.constant dense<0.000000e+00> : vector<32x128xf32>
    %30 = tpu.matmul %1, %29, %cst_20 {dimension_numbers = #tpu.dot_dimension_numbers<[1], [0], [0], [1], [0, 0, 1, 1], [], []>} : vector<32x32xbf16>, vector<32x128xbf16>, vector<32x128xf32> -> vector<32x128xf32>
    %31 = vector.broadcast %5 : vector<32x1xf32> to vector<32x128xf32>
    %32 = arith.addf %30, %31 : vector<32x128xf32>
    %cst_21 = arith.constant 0.000000e+00 : f32
    %33 = vector.broadcast %cst_21 : f32 to vector<32x128xf32>
    %34 = arith.maximumf %32, %33 : vector<32x128xf32>
    %35 = arith.truncf %34 : vector<32x128xf32> to vector<32x128xbf16>
    %cst_22 = arith.constant dense<0.000000e+00> : vector<32x128xf32>
    %36 = tpu.matmul %2, %35, %cst_22 {dimension_numbers = #tpu.dot_dimension_numbers<[1], [0], [0], [1], [0, 0, 1, 1], [], []>} : vector<32x32xbf16>, vector<32x128xbf16>, vector<32x128xf32> -> vector<32x128xf32>
    %37 = vector.broadcast %6 : vector<32x1xf32> to vector<32x128xf32>
    %38 = arith.addf %36, %37 : vector<32x128xf32>
    %39 = arith.addf %26, %38 : vector<32x128xf32>
    %cst_23 = arith.constant 0.000000e+00 : f32
    %40 = vector.broadcast %cst_23 : f32 to vector<32x128xf32>
    %41 = arith.maximumf %39, %40 : vector<32x128xf32>
    %42 = arith.truncf %41 : vector<32x128xf32> to vector<32x128xbf16>
    %cst_24 = arith.constant dense<0.000000e+00> : vector<32x128xf32>
    %43 = tpu.matmul %3, %42, %cst_24 {dimension_numbers = #tpu.dot_dimension_numbers<[1], [0], [0], [1], [0, 0, 1, 1], [], []>} : vector<32x32xbf16>, vector<32x128xbf16>, vector<32x128xf32> -> vector<32x128xf32>
    %44 = vector.broadcast %7 : vector<32x1xf32> to vector<32x128xf32>
    %45 = arith.addf %43, %44 : vector<32x128xf32>
    %46 = vector.extract_strided_slice %45 {offsets = [0, 0], sizes = [8, 128], strides = [1, 1]} : vector<32x128xf32> to vector<8x128xf32>
    %cst_25 = arith.constant dense<0xFF800000> : vector<128xf32>
    %47 = vector.multi_reduction <maximumf>, %46, %cst_25 [0] : vector<8x128xf32> to vector<128xf32>
    %48 = vector.shape_cast %47 : vector<128xf32> to vector<1x128xf32>
    %49 = vector.broadcast %48 : vector<1x128xf32> to vector<8x128xf32>
    %50 = arith.subf %46, %49 : vector<8x128xf32>
    %51 = math.exp %50 : vector<8x128xf32>
    %cst_26 = arith.constant dense<0.000000e+00> : vector<128xf32>
    %52 = vector.multi_reduction <add>, %51, %cst_26 [0] : vector<8x128xf32> to vector<128xf32>
    %53 = vector.shape_cast %52 : vector<128xf32> to vector<1x128xf32>
    %54 = math.log %53 : vector<1x128xf32>
    %55 = vector.broadcast %54 : vector<1x128xf32> to vector<8x128xf32>
    %56 = arith.subf %50, %55 : vector<8x128xf32>
    %c0_27 = arith.constant 0 : index
    %c0_28 = arith.constant 0 : index
    %57 = vector.load %arg4[%c0_27, %c0_28] : memref<32x128xf32, #tpu.memory_space<vmem>>, vector<8x128xf32>
    tpu.vector_store %arg4[%c0_27, %c0_28], %56 {strides = array<i32>} : memref<32x128xf32, #tpu.memory_space<vmem>>, vector<8x128xf32>,
    %58 = vector.extract_strided_slice %45 {offsets = [8, 0], sizes = [8, 128], strides = [1, 1]} : vector<32x128xf32> to vector<8x128xf32>
    %cst_29 = arith.constant dense<0xFF800000> : vector<128xf32>
    %59 = vector.multi_reduction <maximumf>, %58, %cst_29 [0] : vector<8x128xf32> to vector<128xf32>
    %60 = vector.shape_cast %59 : vector<128xf32> to vector<1x128xf32>
    %61 = vector.broadcast %60 : vector<1x128xf32> to vector<8x128xf32>
    %62 = arith.subf %58, %61 : vector<8x128xf32>
    %63 = math.exp %62 : vector<8x128xf32>
    %cst_30 = arith.constant dense<0.000000e+00> : vector<128xf32>
    %64 = vector.multi_reduction <add>, %63, %cst_30 [0] : vector<8x128xf32> to vector<128xf32>
    %65 = vector.shape_cast %64 : vector<128xf32> to vector<1x128xf32>
    %66 = math.log %65 : vector<1x128xf32>
    %67 = vector.broadcast %66 : vector<1x128xf32> to vector<8x128xf32>
    %68 = arith.subf %62, %67 : vector<8x128xf32>
    %c8 = arith.constant 8 : index
    %c0_31 = arith.constant 0 : index
    %69 = vector.load %arg4[%c8, %c0_31] : memref<32x128xf32, #tpu.memory_space<vmem>>, vector<8x128xf32>
    tpu.vector_store %arg4[%c8, %c0_31], %68 {strides = array<i32>} : memref<32x128xf32, #tpu.memory_space<vmem>>, vector<8x128xf32>,
    %70 = vector.extract_strided_slice %45 {offsets = [16, 0], sizes = [8, 128], strides = [1, 1]} : vector<32x128xf32> to vector<8x128xf32>
    %cst_32 = arith.constant dense<0xFF800000> : vector<128xf32>
    %71 = vector.multi_reduction <maximumf>, %70, %cst_32 [0] : vector<8x128xf32> to vector<128xf32>
    %72 = vector.shape_cast %71 : vector<128xf32> to vector<1x128xf32>
    %73 = vector.broadcast %72 : vector<1x128xf32> to vector<8x128xf32>
    %74 = arith.subf %70, %73 : vector<8x128xf32>
    %75 = math.exp %74 : vector<8x128xf32>
    %cst_33 = arith.constant dense<0.000000e+00> : vector<128xf32>
    %76 = vector.multi_reduction <add>, %75, %cst_33 [0] : vector<8x128xf32> to vector<128xf32>
    %77 = vector.shape_cast %76 : vector<128xf32> to vector<1x128xf32>
    %78 = math.log %77 : vector<1x128xf32>
    %79 = vector.broadcast %78 : vector<1x128xf32> to vector<8x128xf32>
    %80 = arith.subf %74, %79 : vector<8x128xf32>
    %c16 = arith.constant 16 : index
    %c0_34 = arith.constant 0 : index
    %81 = vector.load %arg4[%c16, %c0_34] : memref<32x128xf32, #tpu.memory_space<vmem>>, vector<8x128xf32>
    tpu.vector_store %arg4[%c16, %c0_34], %80 {strides = array<i32>} : memref<32x128xf32, #tpu.memory_space<vmem>>, vector<8x128xf32>,
    %82 = vector.extract_strided_slice %45 {offsets = [24, 0], sizes = [8, 128], strides = [1, 1]} : vector<32x128xf32> to vector<8x128xf32>
    %cst_35 = arith.constant dense<0xFF800000> : vector<128xf32>
    %83 = vector.multi_reduction <maximumf>, %82, %cst_35 [0] : vector<8x128xf32> to vector<128xf32>
    %84 = vector.shape_cast %83 : vector<128xf32> to vector<1x128xf32>
    %85 = vector.broadcast %84 : vector<1x128xf32> to vector<8x128xf32>
    %86 = arith.subf %82, %85 : vector<8x128xf32>
    %87 = math.exp %86 : vector<8x128xf32>
    %cst_36 = arith.constant dense<0.000000e+00> : vector<128xf32>
    %88 = vector.multi_reduction <add>, %87, %cst_36 [0] : vector<8x128xf32> to vector<128xf32>
    %89 = vector.shape_cast %88 : vector<128xf32> to vector<1x128xf32>
    %90 = math.log %89 : vector<1x128xf32>
    %91 = vector.broadcast %90 : vector<1x128xf32> to vector<8x128xf32>
    %92 = arith.subf %86, %91 : vector<8x128xf32>
    %c24 = arith.constant 24 : index
    %c0_37 = arith.constant 0 : index
    %93 = vector.load %arg4[%c24, %c0_37] : memref<32x128xf32, #tpu.memory_space<vmem>>, vector<8x128xf32>
    tpu.vector_store %arg4[%c24, %c0_37], %92 {strides = array<i32>} : memref<32x128xf32, #tpu.memory_space<vmem>>, vector<8x128xf32>,
    return
  }
  func.func @transform_0(%arg0: i32) -> (i32, i32) {
    %c0_i32 = arith.constant 0 : i32
    %c0_i32_0 = arith.constant 0 : i32
    return %c0_i32, %arg0 : i32, i32
  }
  func.func @transform_1(%arg0: i32) -> (i32, i32) {
    %c0_i32 = arith.constant 0 : i32
    %c0_i32_0 = arith.constant 0 : i32
    %c0_i32_1 = arith.constant 0 : i32
    return %c0_i32, %c0_i32_0 : i32, i32
  }
  func.func @transform_2(%arg0: i32) -> (i32, i32) {
    %c0_i32 = arith.constant 0 : i32
    %c0_i32_0 = arith.constant 0 : i32
    %c0_i32_1 = arith.constant 0 : i32
    return %c0_i32, %c0_i32_0 : i32, i32
  }
  func.func @transform_3(%arg0: i32) -> (i32, i32) {
    %c0_i32 = arith.constant 0 : i32
    %c0_i32_0 = arith.constant 0 : i32
    return %c0_i32, %arg0 : i32, i32
  }
}

</mosaic_0001>

<bundles_post_ra>
// kernel: torsion_head_forward.1
= control target key start
LH: loop header
LB: loop body
LE: loop exit
PB: predicated region body
PF: predicated region fallthrough
CT: control target
= control target key end

     0   :  { %vm97_vm0 = vcmask 261120   ;;  %v745_v3 = vmov 0   ;;  %s874_s0 = inlined_call_operand.vmem [shape: bf16[32,128], index: 0, kind: input, shape index: {}]   ;;  %s875_s1 = inlined_call_operand.vmem [shape: bf16[128,32], index: 1, kind: input, shape index: {}]   ;;  %s876_s2 = inlined_call_operand.vmem [shape: f32[128,1], index: 2, kind: input, shape index: {}]   ;;  %s877_s3 = inlined_call_operand.vmem [shape: f32[32,128], index: 3, kind: output, shape index: {}]  }
   0x1   :  { %v47_v0 = vld [vmem:[%s874_s0] sm:$0xf]  ;;  %v48_v1 = vld [vmem:[%s874_s0 + $0x4] sm:$0xf]  ;;  %v49_v2 = vld [vmem:[%s874_s0 + $0x8] sm:$0xf]  ;;  %719 = vset.pattern.permute.xlu0 %v745_v3  ;;  %720 = vset.pattern.permute.xlu1 %v745_v3 }
   0x2   :  { %v51_v4 = vmax.bf16 %v745_v3, %v47_v0  ;;  %v52_v5 = vmax.bf16 %v745_v3, %v48_v1  ;;  %v50_v6 = vld [vmem:[%s874_s0 + $0xc] sm:$0xf]  ;;  %v53_v7 = vmax.bf16 %v745_v3, %v49_v2  ;;  %v721_v9 = vld [vmem:[%s875_s1] sm:$0xff]   ;;  %v33_v12 = vld [vmem:[%s876_s2 + $0x10] sm:$0xff] }
   0x3   :  { %v54_v8 = vmax.bf16 %v745_v3, %v50_v6  ;;  %v31_v11 = vld [vmem:[%s876_s2] sm:$0xff]  ;;  %674 = vmatprep.mubr.msk.bf16.mxu0 %vm97_vm0, %v721_v9  ;;  %67 = vperm.xlu1 %720, %v33_v12   ;;  %v32_v14 = vld [vmem:[%s876_s2 + $0x8] sm:$0xff]  ;;  %v34_v15 = vld [vmem:[%s876_s2 + $0x18] sm:$0xff] }
   0x4   :  { %v626_v10 = vcombine.low %v51_v4, %v52_v5  ;;  %57 = vperm.xlu0 %719, %v31_v11   ;;  %v722_v16 = vld [vmem:[%s875_s1 + $0x8] sm:$0xff]   ;;  %v35_v17 = vld [vmem:[%s876_s2 + $0x20] sm:$0xff]  ;;  %v37_v19 = vld [vmem:[%s876_s2 + $0x30] sm:$0xff] }
   0x5   :  { %v627_v13 = vcombine.low %v53_v7, %v54_v8  ;;  %v36_v18 = vld [vmem:[%s876_s2 + $0x28] sm:$0xff]  ;;  %v38_v20 = vld [vmem:[%s876_s2 + $0x38] sm:$0xff]  ;;  %v39_v21 = vld [vmem:[%s876_s2 + $0x40] sm:$0xff] }
   0x6   :  { %670 = vmatprep.subr.bf16.mxu0 %v626_v10  ;;  %v40_v22 = vld [vmem:[%s876_s2 + $0x48] sm:$0xff]  ;;  %v41_v23 = vld [vmem:[%s876_s2 + $0x50] sm:$0xff]  ;;  %v42_v24 = vld [vmem:[%s876_s2 + $0x58] sm:$0xff] }
   0x7   :  { %671 = vmatpush3.bf16.msra.mxu0 %v626_v10  ;;  %72 = vperm.xlu1 %720, %v34_v15   ;;  %v43_v25 = vld [vmem:[%s876_s2 + $0x60] sm:$0xff]  ;;  %v44_v26 = vld [vmem:[%s876_s2 + $0x68] sm:$0xff]  ;;  %v45_v27 = vld [vmem:[%s876_s2 + $0x70] sm:$0xff] }
   0x8   :  { %672 = vmatprep.subr.bf16.mxu0 %v627_v13  ;;  %62 = vperm.xlu0 %719, %v32_v14   ;;  %v46_v28 = vld [vmem:[%s876_s2 + $0x78] sm:$0xff]  ;;  %v723_v29 = vld [vmem:[%s875_s1 + $0x10] sm:$0xff]   ;;  %v725_v49 = vld [vmem:[%s875_s1 + $0x20] sm:$0xff]  }
   0x9   :  { %682 = vmatprep.mubr.msk.bf16.mxu1 %vm97_vm0, %v723_v29  ;;  %v724_v48 = vld [vmem:[%s875_s1 + $0x18] sm:$0xff]   ;;  %v726_v4 = vld [vmem:[%s875_s1 + $0x28] sm:$0xff]  }
   0xb   :  { %673 = vmatpush3.bf16.msra.mxu0 %v627_v13  ;;  %166 = vperm.xlu1 %720, %v36_v18  }
   0xc   :  { %161 = vperm.xlu0 %719, %v35_v17  }
   0xe   :  { %675 = vmatmul.mubr.msk.bf16.vlgmr.msra.gmra.mrb[0].mxu0 %vm97_vm0, %v722_v16 }
   0xf   :  { %176 = vperm.xlu1 %720, %v38_v20   ;;  %690 = vmatprep.mubr.msk.bf16.mxu0 %vm97_vm0, %v725_v49 }
  0x10   :  { %171 = vperm.xlu0 %719, %v37_v19  }
  0x13   :  { %257 = vperm.xlu1 %720, %v40_v22  }
  0x14   :  { %252 = vperm.xlu0 %719, %v39_v21  }
  0x17   :  { %267 = vperm.xlu1 %720, %v42_v24  }
  0x18   :  { %262 = vperm.xlu0 %719, %v41_v23  }
  0x1b   :  { %466 = vperm.xlu1 %720, %v44_v26  }
  0x1c   :  { %461 = vperm.xlu0 %719, %v43_v25  }
  0x1f   :  { %476 = vperm.xlu1 %720, %v46_v28  }
  0x20   :  { %471 = vperm.xlu0 %719, %v45_v27  }
  0x82   :  { %v68_v30 = vpop.permute.xlu1 %67 }
  0x83   :  { %v58_v31 = vpop.permute.xlu0 %57 }
  0x86   :  { %v73_v34 = vpop.permute.xlu1 %72 }
  0x87   :  { %v63_v37 = vpop.permute.xlu0 %62 }
  0x8a   :  { %v167_v51 = vpop.permute.xlu1 %166 }
  0x8b   :  { %v162_v50 = vpop.permute.xlu0 %161 }
  0x8e   :  { %v177_v56 = vpop.permute.xlu1 %176 }
  0x8f   :  { %v172_v52 = vpop.permute.xlu0 %171 }
  0x92   :  { %v258_v6 = vpop.permute.xlu1 %257 }
  0x93   :  { %v253_v5 = vpop.permute.xlu0 %252 }
  0x96   :  { %v268_v10 = vpop.permute.xlu1 %267 }
  0x97   :  { %v263_v8 = vpop.permute.xlu0 %262 }
  0xe1   :  { %v676_v32 = vpop.f32.mrb[0].mxu0 }
  0xe2   :  { %v138_v33 = vpop.f32.mrb[1].mxu0  ;;  %v147_v40 = vadd.f32 %v676_v32, %v68_v30 }
  0xe3   :  { %v139_v35 = vadd.f32 %v138_v33, %v58_v31  ;;  %v677_v36 = vpop.f32.mrb[2].mxu0 }
  0xe4   :  { %v150_v38 = vadd.f32 %v677_v36, %v73_v34  ;;  %v141_v39 = vpop.f32.mrb[3].mxu0  ;;  %v155_v45 = vmax.f32 %v147_v40, 0.0 }
  0xe5   :  { %v142_v41 = vadd.f32 %v141_v39, %v63_v37  ;;  %v153_v42 = vmax.f32 %v139_v35, 0.0 }
  0xe6   :  { %v156_v43 = vmax.f32 %v150_v38, 0.0 }
  0xe7   :  { %v154_v44 = vmax.f32 %v142_v41, 0.0 }
  0xe8   :  { %v158_v47 = vpack.c.bf16 %v156_v43, %v155_v45 }
  0xe9   :  { %v157_v46 = vpack.c.bf16 %v154_v44, %v153_v42 }
  0xeb   :  { %678 = vmatprep.subr.bf16.mxu1 %v157_v46 }
  0xec   :  { %679 = vmatpush3.bf16.msra.mxu1 %v157_v46 }
  0xed   :  { %680 = vmatprep.subr.bf16.mxu1 %v158_v47 }
  0xf0   :  { %681 = vmatpush3.bf16.msra.mxu1 %v158_v47 }
  0xf3   :  { %683 = vmatmul.mubr.msk.bf16.vlgmr.msra.gmra.mrb[0].mxu1 %vm97_vm0, %v724_v48 }
  0xf4   :  { %698 = vmatprep.mubr.msk.bf16.mxu1 %vm97_vm0, %v723_v29 }
 0x1c6   :  { %v684_v53 = vpop.f32.mrb[0].mxu1 }
 0x1c7   :  { %v238_v54 = vadd.f32 %v684_v53, %v172_v52  ;;  %v229_v55 = vpop.f32.mrb[1].mxu1 }
 0x1c8   :  { %v230_v57 = vadd.f32 %v229_v55, %v162_v50  ;;  %v685_v58 = vpop.f32.mrb[2].mxu1 }
 0x1c9   :  { %v241_v59 = vadd.f32 %v685_v58, %v177_v56  ;;  %v232_v60 = vpop.f32.mrb[3].mxu1  ;;  %v246_v62 = vmax.f32 %v238_v54, 0.0 }
 0x1ca   :  { %v233_v61 = vadd.f32 %v232_v60, %v167_v51  ;;  %v244_v0 = vmax.f32 %v230_v57, 0.0  ;;  %v728_v60 = vld [vmem:[%s875_s1 + $0x38] sm:$0xff]  }
 0x1cb   :  { %v247_v63 = vmax.f32 %v241_v59, 0.0 }
 0x1cc   :  { %v245_v1 = vmax.f32 %v233_v61, 0.0  ;;  %v462_v61 = vpop.permute.xlu0 %461 }
 0x1cd   :  { %v249_v2 = vpack.c.bf16 %v247_v63, %v246_v62  ;;  %v467_v62 = vpop.permute.xlu1 %466 }
 0x1ce   :  { %v248_v3 = vpack.c.bf16 %v245_v1, %v244_v0 }
 0x1d0   :  { %686 = vmatprep.subr.bf16.mxu0 %v248_v3  ;;  %v472_v63 = vpop.permute.xlu0 %471 }
 0x1d1   :  { %687 = vmatpush3.bf16.msra.mxu0 %v248_v3  ;;  %v477_v3 = vpop.permute.xlu1 %476 }
 0x1d2   :  { %688 = vmatprep.subr.bf16.mxu0 %v249_v2 }
 0x1d5   :  { %689 = vmatpush3.bf16.msra.mxu0 %v249_v2 }
 0x1d8   :  { %691 = vmatmul.mubr.msk.bf16.vlgmr.msra.gmra.mrb[4].mxu0 %vm97_vm0, %v726_v4 }
 0x1d9   :  { %706 = vmatprep.mubr.msk.bf16.mxu0 %vm97_vm0, %v725_v49 }
 0x2ab   :  { %v692_v7 = vpop.f32.mrb[4].mxu0 }
 0x2ac   :  { %v320_v9 = vpop.f32.mrb[5].mxu0  ;;  %v329_v11 = vadd.f32 %v692_v7, %v263_v8 }
 0x2ad   :  { %v321_v12 = vadd.f32 %v320_v9, %v253_v5  ;;  %v693_v13 = vpop.f32.mrb[6].mxu0 }
 0x2ae   :  { %v332_v14 = vadd.f32 %v693_v13, %v268_v10  ;;  %v323_v15 = vpop.f32.mrb[7].mxu0  ;;  %v337_v19 = vadd.f32 %v329_v11, %v147_v40 }
 0x2af   :  { %v335_v16 = vadd.f32 %v321_v12, %v139_v35  ;;  %v324_v17 = vadd.f32 %v323_v15, %v258_v6 }
 0x2b0   :  { %v338_v18 = vadd.f32 %v332_v14, %v150_v38  ;;  %v341_v24 = vmax.f32 %v337_v19, 0.0 }
 0x2b1   :  { %v336_v20 = vadd.f32 %v324_v17, %v142_v41  ;;  %v339_v21 = vmax.f32 %v335_v16, 0.0  ;;  %v727_v41 = vld [vmem:[%s875_s1 + $0x30] sm:$0xff]  }
 0x2b2   :  { %v342_v22 = vmax.f32 %v338_v18, 0.0 }
 0x2b3   :  { %v340_v23 = vmax.f32 %v336_v20, 0.0 }
 0x2b4   :  { %v344_v26 = vpack.c.bf16 %v342_v22, %v341_v24 }
 0x2b5   :  { %v343_v25 = vpack.c.bf16 %v340_v23, %v339_v21 }
 0x2b7   :  { %694 = vmatprep.subr.bf16.mxu1 %v343_v25 }
 0x2b8   :  { %695 = vmatpush3.bf16.msra.mxu1 %v343_v25 }
 0x2b9   :  { %696 = vmatprep.subr.bf16.mxu1 %v344_v26 }
 0x2bc   :  { %697 = vmatpush3.bf16.msra.mxu1 %v344_v26 }
 0x2bf   :  { %699 = vmatmul.mubr.msk.bf16.vlgmr.msra.gmra.mrb[4].mxu1 %vm97_vm0, %v724_v48 }
 0x2c0   :  { %714 = vmatprep.mubr.msk.bf16.mxu1 %vm97_vm0, %v727_v41 }
 0x392   :  { %v700_v27 = vpop.f32.mrb[4].mxu1 }
 0x393   :  { %v388_v28 = vadd.f32 %v700_v27, %v172_v52  ;;  %v379_v29 = vpop.f32.mrb[5].mxu1 }
 0x394   :  { %v380_v30 = vadd.f32 %v379_v29, %v162_v50  ;;  %v701_v31 = vpop.f32.mrb[6].mxu1 }
 0x395   :  { %v391_v32 = vadd.f32 %v701_v31, %v177_v56  ;;  %v382_v33 = vpop.f32.mrb[7].mxu1  ;;  %v396_v35 = vmax.f32 %v388_v28, 0.0 }
 0x396   :  { %v383_v34 = vadd.f32 %v382_v33, %v167_v51  ;;  %v394_v37 = vmax.f32 %v380_v30, 0.0 }
 0x397   :  { %v397_v36 = vmax.f32 %v391_v32, 0.0 }
 0x398   :  { %v395_v38 = vmax.f32 %v383_v34, 0.0 }
 0x399   :  { %v399_v39 = vpack.c.bf16 %v397_v36, %v396_v35 }
 0x39a   :  { %v398_v40 = vpack.c.bf16 %v395_v38, %v394_v37 }
 0x39c   :  { %702 = vmatprep.subr.bf16.mxu0 %v398_v40 }
 0x39d   :  { %703 = vmatpush3.bf16.msra.mxu0 %v398_v40 }
 0x39e   :  { %704 = vmatprep.subr.bf16.mxu0 %v399_v39 }
 0x3a1   :  { %705 = vmatpush3.bf16.msra.mxu0 %v399_v39 }
 0x3a4   :  { %707 = vmatmul.mubr.msk.bf16.vlgmr.msra.gmra.mrb[8].mxu0 %vm97_vm0, %v726_v4 }
 0x477   :  { %v708_v42 = vpop.f32.mrb[8].mxu0 }
 0x478   :  { %v443_v43 = vadd.f32 %v708_v42, %v263_v8  ;;  %v434_v44 = vpop.f32.mrb[9].mxu0 }
 0x479   :  { %v435_v45 = vadd.f32 %v434_v44, %v253_v5  ;;  %v709_v46 = vpop.f32.mrb[10].mxu0 }
 0x47a   :  { %v451_v47 = vadd.f32 %v443_v43, %v337_v19  ;;  %v446_v48 = vadd.f32 %v709_v46, %v268_v10  ;;  %v437_v49 = vpop.f32.mrb[11].mxu0 }
 0x47b   :  { %v449_v50 = vadd.f32 %v435_v45, %v335_v16  ;;  %v438_v51 = vadd.f32 %v437_v49, %v258_v6 }
 0x47c   :  { %v452_v52 = vadd.f32 %v446_v48, %v338_v18  ;;  %v455_v54 = vmax.f32 %v451_v47, 0.0 }
 0x47d   :  { %v450_v53 = vadd.f32 %v438_v51, %v336_v20  ;;  %v453_v56 = vmax.f32 %v449_v50, 0.0 }
 0x47e   :  { %v456_v55 = vmax.f32 %v452_v52, 0.0 }
 0x47f   :  { %v454_v57 = vmax.f32 %v450_v53, 0.0 }
 0x480   :  { %v458_v58 = vpack.c.bf16 %v456_v55, %v455_v54 }
 0x481   :  { %v457_v59 = vpack.c.bf16 %v454_v57, %v453_v56 }
 0x483   :  { %710 = vmatprep.subr.bf16.mxu1 %v457_v59 }
 0x484   :  { %711 = vmatpush3.bf16.msra.mxu1 %v457_v59 }
 0x485   :  { %712 = vmatprep.subr.bf16.mxu1 %v458_v58 }
 0x488   :  { %713 = vmatpush3.bf16.msra.mxu1 %v458_v58 }
 0x48b   :  { %715 = vmatmul.mubr.msk.bf16.vlgmr.msra.gmra.mrb[8].mxu1 %vm97_vm0, %v728_v60 }
 0x55e   :  { %v716_v0 = vpop.f32.mrb[8].mxu1 }
 0x55f   :  { %v538_v1 = vadd.f32 %v716_v0, %v472_v63  ;;  %v529_v2 = vpop.f32.mrb[9].mxu1 }
 0x560   :  { %v530_v4 = vadd.f32 %v529_v2, %v462_v61  ;;  %v717_v5 = vpop.f32.mrb[10].mxu1 }
 0x561   :  { %v582_v6 = vrot.slane %v538_v1, 4  ;;  %v541_v7 = vadd.f32 %v717_v5, %v477_v3  ;;  %v532_v8 = vpop.f32.mrb[11].mxu1 }
 0x562   :  { %v544_v9 = vrot.slane %v530_v4, 4  ;;  %v533_v10 = vadd.f32 %v532_v8, %v467_v62 }
 0x563   :  { %v583_v11 = vmax.f32 %v538_v1, %v582_v6  ;;  %v601_v12 = vrot.slane %v541_v7, 4 }
 0x564   :  { %v545_v13 = vmax.f32 %v530_v4, %v544_v9  ;;  %v563_v14 = vrot.slane %v533_v10, 4 }
 0x565   :  { %v584_v15 = vrot.slane %v583_v11, 2  ;;  %v602_v16 = vmax.f32 %v541_v7, %v601_v12 }
 0x566   :  { %v546_v17 = vrot.slane %v545_v13, 2  ;;  %v564_v18 = vmax.f32 %v533_v10, %v563_v14 }
 0x567   :  { %v585_v19 = vmax.f32 %v583_v11, %v584_v15  ;;  %v603_v20 = vrot.slane %v602_v16, 2 }
 0x568   :  { %v547_v21 = vmax.f32 %v545_v13, %v546_v17  ;;  %v565_v22 = vrot.slane %v564_v18, 2 }
 0x569   :  { %v586_v23 = vrot.slane %v585_v19, 1  ;;  %v604_v24 = vmax.f32 %v602_v16, %v603_v20 }
 0x56a   :  { %v548_v25 = vrot.slane %v547_v21, 1  ;;  %v566_v26 = vmax.f32 %v564_v18, %v565_v22 }
 0x56b   :  { %v587_v27 = vmax.f32 %v585_v19, %v586_v23  ;;  %v605_v28 = vrot.slane %v604_v24, 1 }
 0x56c   :  { %v549_v29 = vmax.f32 %v547_v21, %v548_v25  ;;  %v567_v30 = vrot.slane %v566_v26, 1 }
 0x56d   :  { %v588_v31 = vsub.f32 %v538_v1, %v587_v27  ;;  %v606_v32 = vmax.f32 %v604_v24, %v605_v28 }
 0x56e   :  { %v550_v33 = vsub.f32 %v530_v4, %v549_v29  ;;  %v568_v34 = vmax.f32 %v566_v26, %v567_v30 }
 0x56f   :  { %v589_v35 = vmul.f32 1.442695, %v588_v31  ;;  %v607_v36 = vsub.f32 %v541_v7, %v606_v32 }
 0x570   :  { %v551_v37 = vmul.f32 1.442695, %v550_v33  ;;  %v569_v38 = vsub.f32 %v533_v10, %v568_v34 }
 0x571   :  { %729 = vpow2.f32 %v589_v35  ;;  %v608_v39 = vmul.f32 1.442695, %v607_v36 }
 0x572   :  { %731 = vpow2.f32 %v551_v37  ;;  %v570_v40 = vmul.f32 1.442695, %v569_v38 }
 0x573   :  { %733 = vpow2.f32 %v608_v39 }
 0x574   :  { %735 = vpow2.f32 %v570_v40 }
 0x57b   :  { %v730_v41 = vpop.eup %729 }
 0x57c   :  { %v732_v42 = vpop.eup %731  ;;  %v591_v43 = vrot.slane %v730_v41, 4 }
 0x57d   :  { %v734_v44 = vpop.eup %733  ;;  %v553_v45 = vrot.slane %v732_v42, 4 }
 0x57e   :  { %v736_v46 = vpop.eup %735  ;;  %v592_v47 = vadd.f32 %v730_v41, %v591_v43  ;;  %v610_v48 = vrot.slane %v734_v44, 4 }
 0x57f   :  { %v554_v49 = vadd.f32 %v732_v42, %v553_v45  ;;  %v572_v50 = vrot.slane %v736_v46, 4 }
 0x580   :  { %v593_v51 = vrot.slane %v592_v47, 2  ;;  %v611_v52 = vadd.f32 %v734_v44, %v610_v48 }
 0x581   :  { %v555_v53 = vrot.slane %v554_v49, 2  ;;  %v573_v54 = vadd.f32 %v736_v46, %v572_v50 }
 0x582   :  { %v594_v55 = vadd.f32 %v593_v51, %v592_v47  ;;  %v612_v56 = vrot.slane %v611_v52, 2 }
 0x583   :  { %v556_v57 = vadd.f32 %v555_v53, %v554_v49  ;;  %v574_v58 = vrot.slane %v573_v54, 2 }
 0x584   :  { %v595_v59 = vrot.slane %v594_v55, 1  ;;  %v613_v60 = vadd.f32 %v612_v56, %v611_v52 }
 0x585   :  { %v557_v61 = vrot.slane %v556_v57, 1  ;;  %v575_v62 = vadd.f32 %v574_v58, %v573_v54 }
 0x586   :  { %v596_v63 = vadd.f32 %v595_v59, %v594_v55  ;;  %v614_v0 = vrot.slane %v613_v60, 1 }
 0x587   :  { %v558_v1 = vadd.f32 %v557_v61, %v556_v57  ;;  %v576_v2 = vrot.slane %v575_v62, 1 }
 0x588   :  { %737 = vlog2.f32 %v596_v63  ;;  %v615_v3 = vadd.f32 %v614_v0, %v613_v60 }
 0x589   :  { %739 = vlog2.f32 %v558_v1  ;;  %v577_v4 = vadd.f32 %v576_v2, %v575_v62 }
 0x58a   :  { %741 = vlog2.f32 %v615_v3 }
 0x58b   :  { %743 = vlog2.f32 %v577_v4 }
 0x592   :  { %v738_v5 = vpop.eup %737 }
 0x593   :  { %v740_v6 = vpop.eup %739  ;;  %v598_v7 = vmul.f32 0.6931472, %v738_v5 }
 0x594   :  { %v742_v8 = vpop.eup %741  ;;  %v560_v9 = vmul.f32 0.6931472, %v740_v6 }
 0x595   :  { %v744_v10 = vpop.eup %743  ;;  %v599_v11 = vsub.f32 %v588_v31, %v598_v7  ;;  %v617_v12 = vmul.f32 0.6931472, %v742_v8 }
 0x596   :  { %v561_v13 = vsub.f32 %v550_v33, %v560_v9  ;;  %v579_v14 = vmul.f32 0.6931472, %v744_v10 }
 0x597   :  { %600 = vst [vmem:[%s877_s3 + $0x10] sm:$0xff] %v599_v11  ;;  %v618_v15 = vsub.f32 %v607_v36, %v617_v12 }
 0x598   :  { %562 = vst [vmem:[%s877_s3] sm:$0xff] %v561_v13  ;;  %v580_v16 = vsub.f32 %v569_v38, %v579_v14 }
 0x599   :  { %619 = vst [vmem:[%s877_s3 + $0x18] sm:$0xff] %v618_v15 }
 0x59a   :  { %581 = vst [vmem:[%s877_s3 + $0x8] sm:$0xff] %v580_v16 }

</bundles_post_ra>
